<compile_context>
chip_gen: v6e
topology: v6e:2x2x1
jax: 0.10.0
libtpu: 0.0.40
codegen_flags: <defaults>
</compile_context>

<pallas_src>
from functools import partial

import jax
import jax.numpy as jnp
import numpy as np
from jax.experimental import pallas as pl
from jax.experimental.pallas import tpu as pltpu


def control_unit_kernel(pc_ref, pq_ref, mem_ref, qr_ref, wqc_ref, bqc_ref,
                        ba_ref, ci_ref, cvis_ref, *, activation):
    f32 = jnp.float32
    H2 = pc_ref.shape[-1]                 # 2 * hidden_size
    mxu_dt = wqc_ref.dtype                # bf16 (v6e/v7x) or f32; set at init time

    # --- g = query_control(cat(prev_control, prev_query, memory)) * W_attend ---
    # W_attend already folded into wqc/bqc at init; concat fused away via three
    # partial MXU dots against static (free) slices of the weight.  Accumulation
    # and bias add stay f32.
    g = (jnp.dot(pc_ref[...].astype(mxu_dt), wqc_ref[0:H2, :],
                 preferred_element_type=f32)
         + jnp.dot(pq_ref[...].astype(mxu_dt), wqc_ref[H2:2 * H2, :],
                   preferred_element_type=f32)
         + jnp.dot(mem_ref[...].astype(mxu_dt), wqc_ref[2 * H2:3 * H2, :],
                   preferred_element_type=f32)
         + bqc_ref[...])                                     # [B, 2H] f32

    qr = qr_ref[...]                                         # [S, B, 2H] f32
    ba = ba_ref[0]                                           # attend bias (SMEM scalar)

    # attend(cqi * query_repr): cais[s, b] = <qr[s, b, :], g[b, :]> + b_attend.
    # VPU multiply + lane reduce; linear in B (no score matrix, no masks).
    cais = jnp.sum(qr * g[None, :, :], axis=-1, keepdims=True) + ba   # [S, B, 1]

    if activation == "softmax":
        # Softmax over the sequence axis (axis 0), all in f32.
        m = jnp.max(cais, axis=0, keepdims=True)                      # [1, B, 1]
        e = jnp.exp(cais - m)                                         # [S, B, 1]
        denom = jnp.sum(e, axis=0, keepdims=True)                     # [1, B, 1]
        p = e * pl.reciprocal(denom, approx=False)                    # exact recip on EUP
    else:  # "sigmoid"
        p = pl.reciprocal(1.0 + jnp.exp(-cais), approx=False)         # [S, B, 1]

    cvis_ref[...] = p.astype(cvis_ref.dtype)                          # [S, B, 1]

    # ci[b, h] = sum_s cvis[s, b] * qr[s, b, h] — broadcast over lanes,
    # accumulate over the un-tiled leading axis (cheap VPU adds).
    ci_ref[...] = jnp.sum(p * qr, axis=0).astype(ci_ref.dtype)        # [B, 2H]


@partial(jax.jit, static_argnames=("activation",))
def control_unit(prev_control, prev_query, query_repr, memory, folded_params,
                 activation="softmax"):
    """Forward of ControlUnit. Returns (ci [B, 2H], cvis [S, B, 1])."""
    wqc_f, bqc_f, ba_f = folded_params
    S, B, twoH = query_repr.shape
    w_itemsize = jnp.dtype(wqc_f.dtype).itemsize

    flops = (2 * B * (3 * twoH) * twoH        # query_control linear
             + 4 * S * B * twoH               # attend scores + ci weighted sum
             + 10 * S * B)                    # softmax / sigmoid elementwise
    transcendentals = S * B + B               # exp + reciprocal
    bytes_accessed = (4 * (3 * B * twoH + S * B * twoH + twoH + 1
                           + B * twoH + S * B)
                      + w_itemsize * 3 * twoH * twoH)

    vmem = pl.BlockSpec(memory_space=pltpu.MemorySpace.VMEM)
    smem = pl.BlockSpec(memory_space=pltpu.MemorySpace.SMEM)

    ci, cvis = pl.pallas_call(
        partial(control_unit_kernel, activation=activation),
        out_shape=(jax.ShapeDtypeStruct((B, twoH), jnp.float32),
                   jax.ShapeDtypeStruct((S, B, 1), jnp.float32)),
        in_specs=[vmem, vmem, vmem, vmem, vmem, vmem, smem],
        out_specs=(vmem, vmem),
        cost_estimate=pl.CostEstimate(flops=flops,
                                      transcendentals=transcendentals,
                                      bytes_accessed=bytes_accessed),
    )(prev_control, prev_query, memory, query_repr, wqc_f, bqc_f, ba_f)
    return ci, cvis


def init_params(key, hidden_size):
    """Deterministic synthetic init mirroring the PyTorch module's parameters
    (nn.Linear-style uniform bounds). Weight stored transposed: [in, out]."""
    twoH, sixH = 2 * hidden_size, 6 * hidden_size
    k1, k2, k3, k4 = jax.random.split(key, 4)
    lim1 = 1.0 / np.sqrt(sixH)
    wqc = jax.random.uniform(k1, (sixH, twoH), jnp.float32, -lim1, lim1)  # query_control weight
    bqc = jax.random.uniform(k2, (1, twoH), jnp.float32, -lim1, lim1)     # query_control bias
    lim2 = 1.0 / np.sqrt(twoH)
    wa = jax.random.uniform(k3, (1, twoH), jnp.float32, -lim2, lim2)      # attend weight
    ba = jax.random.uniform(k4, (1, 1), jnp.float32, -lim2, lim2)         # attend bias
    return wqc, bqc, wa, ba


def fold_control_unit_params(params, mxu_dtype=jnp.bfloat16):
    """ONE-TIME parameter transform (do at init / checkpoint-load time, never
    per call): fold the attend weight into query_control and store the weight
    in the MXU compute dtype (bf16 for v6e/v7x peak, f32 for exactness)."""
    wqc, bqc, wa, ba = params
    wqc_f = (wqc * wa).astype(mxu_dtype)          # [6H, 2H]
    bqc_f = (bqc * wa).astype(jnp.float32)        # [1, 2H] (added post-accumulation in f32)
    ba_f = ba.reshape(1).astype(jnp.float32)      # (1,) attend bias -> SMEM scalar
    return wqc_f, bqc_f, ba_f


if __name__ == "__main__":
    H, B, S = 32, 2, 8                     # hidden_size=32 -> 2H=64, 6H=192
    key = jax.random.PRNGKey(0)
    kp, kc, kq, kr, km = jax.random.split(key, 5)
    params = init_params(kp, H)

    prev_control = jax.random.normal(kc, (B, 2 * H), jnp.float32)
    prev_query   = jax.random.normal(kq, (B, 2 * H), jnp.float32)
    query_repr   = jax.random.normal(kr, (S, B, 2 * H), jnp.float32)
    memory       = jax.random.normal(km, (B, 2 * H), jnp.float32)

    # Pure-JAX reference mirroring the PyTorch forward (unfolded f32 params).
    wqc, bqc, wa, ba = params
    x = jnp.concatenate([prev_control, prev_query, memory], axis=-1)
    cqi_r = x @ wqc + bqc
    cais_r = jnp.sum((cqi_r[None] * query_repr) * wa[None], axis=-1, keepdims=True) + ba
    cvis_r = jax.nn.softmax(cais_r, axis=0)
    ci_r = jnp.sum(cvis_r * query_repr, axis=0)
    cvis_sr = jax.nn.sigmoid(cais_r)
    ci_sr = jnp.sum(cvis_sr * query_repr, axis=0)

    # --- f32 MXU operands: exact check (softmax + sigmoid branches) ---
    p_f32 = fold_control_unit_params(params, mxu_dtype=jnp.float32)

    ci, cvis = control_unit(prev_control, prev_query, query_repr, memory, p_f32)
    jax.block_until_ready((ci, cvis))
    np.testing.assert_allclose(np.asarray(ci), np.asarray(ci_r), rtol=1e-5, atol=1e-5)
    np.testing.assert_allclose(np.asarray(cvis), np.asarray(cvis_r), rtol=1e-5, atol=1e-5)

    ci_s, cvis_s = control_unit(prev_control, prev_query, query_repr, memory, p_f32,
                                activation="sigmoid")
    jax.block_until_ready((ci_s, cvis_s))
    np.testing.assert_allclose(np.asarray(ci_s), np.asarray(ci_sr), rtol=1e-5, atol=1e-5)
    np.testing.assert_allclose(np.asarray(cvis_s), np.asarray(cvis_sr), rtol=1e-5, atol=1e-5)

    # --- production config for v6e/v7x: bf16 MXU operands, f32 accumulation ---
    p_bf16 = fold_control_unit_params(params, mxu_dtype=jnp.bfloat16)
    ci_b, cvis_b = control_unit(prev_control, prev_query, query_repr, memory, p_bf16)
    jax.block_until_ready((ci_b, cvis_b))
    np.testing.assert_allclose(np.asarray(ci_b), np.asarray(ci_r), rtol=5e-2, atol=5e-2)
    np.testing.assert_allclose(np.asarray(cvis_b), np.asarray(cvis_r), rtol=5e-2, atol=5e-2)

    print("KERNEL_OK")
</pallas_src>

<mosaic_0001>
module attributes {stable_mosaic.version = 11 : i64} {
  func.func @control_unit_kernel(%arg0: memref<2x64xf32, #tpu.memory_space<vmem>>, %arg1: memref<2x64xf32, #tpu.memory_space<vmem>>, %arg2: memref<2x64xf32, #tpu.memory_space<vmem>>, %arg3: memref<8x2x64xf32, #tpu.memory_space<vmem>>, %arg4: memref<192x64xf32, #tpu.memory_space<vmem>>, %arg5: memref<1x64xf32, #tpu.memory_space<vmem>>, %arg6: memref<1xf32, #tpu.memory_space<smem>>, %arg7: memref<2x64xf32, #tpu.memory_space<vmem>>, %arg8: memref<8x2x1xf32, #tpu.memory_space<vmem>>) attributes {dimension_semantics = [], scalar_prefetch = 0 : i64, scratch_operands = 0 : i64, tpu.core_type = #tpu.core_type<tc>} {
    %c0 = arith.constant 0 : index
    %c0_0 = arith.constant 0 : index
    %0 = vector.load %arg0[%c0, %c0_0] : memref<2x64xf32, #tpu.memory_space<vmem>>, vector<2x64xf32>
    %c0_1 = arith.constant 0 : index
    %c0_2 = arith.constant 0 : index
    %1 = vector.load %arg4[%c0_1, %c0_2] : memref<192x64xf32, #tpu.memory_space<vmem>>, vector<64x64xf32>
    %cst = arith.constant dense<0.000000e+00> : vector<2x64xf32>
    %2 = tpu.matmul %0, %1, %cst {dimension_numbers = #tpu.dot_dimension_numbers<[1], [0], [0], [1], [0, 0, 1, 1], [], []>} : vector<2x64xf32>, vector<64x64xf32>, vector<2x64xf32> -> vector<2x64xf32>
    %c0_3 = arith.constant 0 : index
    %c0_4 = arith.constant 0 : index
    %3 = vector.load %arg1[%c0_3, %c0_4] : memref<2x64xf32, #tpu.memory_space<vmem>>, vector<2x64xf32>
    %c64 = arith.constant 64 : index
    %c0_5 = arith.constant 0 : index
    %4 = vector.load %arg4[%c64, %c0_5] : memref<192x64xf32, #tpu.memory_space<vmem>>, vector<64x64xf32>
    %cst_6 = arith.constant dense<0.000000e+00> : vector<2x64xf32>
    %5 = tpu.matmul %3, %4, %cst_6 {dimension_numbers = #tpu.dot_dimension_numbers<[1], [0], [0], [1], [0, 0, 1, 1], [], []>} : vector<2x64xf32>, vector<64x64xf32>, vector<2x64xf32> -> vector<2x64xf32>
    %6 = arith.addf %2, %5 : vector<2x64xf32>
    %c0_7 = arith.constant 0 : index
    %c0_8 = arith.constant 0 : index
    %7 = vector.load %arg2[%c0_7, %c0_8] : memref<2x64xf32, #tpu.memory_space<vmem>>, vector<2x64xf32>
    %c128 = arith.constant 128 : index
    %c0_9 = arith.constant 0 : index
    %8 = vector.load %arg4[%c128, %c0_9] : memref<192x64xf32, #tpu.memory_space<vmem>>, vector<64x64xf32>
    %cst_10 = arith.constant dense<0.000000e+00> : vector<2x64xf32>
    %9 = tpu.matmul %7, %8, %cst_10 {dimension_numbers = #tpu.dot_dimension_numbers<[1], [0], [0], [1], [0, 0, 1, 1], [], []>} : vector<2x64xf32>, vector<64x64xf32>, vector<2x64xf32> -> vector<2x64xf32>
    %10 = arith.addf %6, %9 : vector<2x64xf32>
    %c0_11 = arith.constant 0 : index
    %c0_12 = arith.constant 0 : index
    %11 = vector.load %arg5[%c0_11, %c0_12] : memref<1x64xf32, #tpu.memory_space<vmem>>, vector<1x64xf32>
    %12 = vector.broadcast %11 : vector<1x64xf32> to vector<2x64xf32>
    %13 = arith.addf %10, %12 : vector<2x64xf32>
    %c0_13 = arith.constant 0 : index
    %c0_14 = arith.constant 0 : index
    %c0_15 = arith.constant 0 : index
    %14 = vector.load %arg3[%c0_13, %c0_14, %c0_15] : memref<8x2x64xf32, #tpu.memory_space<vmem>>, vector<8x2x64xf32>
    %c0_16 = arith.constant 0 : index
    %15 = memref.load %arg6[%c0_16] : memref<1xf32, #tpu.memory_space<smem>>
    %16 = vector.shape_cast %13 : vector<2x64xf32> to vector<1x2x64xf32>
    %17 = vector.broadcast %16 : vector<1x2x64xf32> to vector<8x2x64xf32>
    %18 = arith.mulf %14, %17 : vector<8x2x64xf32>
    %cst_17 = arith.constant dense<0.000000e+00> : vector<8x2xf32>
    %19 = vector.multi_reduction <add>, %18, %cst_17 [2] : vector<8x2x64xf32> to vector<8x2xf32>
    %20 = vector.shape_cast %19 : vector<8x2xf32> to vector<8x2x1xf32>
    %21 = vector.broadcast %15 : f32 to vector<8x2x1xf32>
    %22 = arith.addf %20, %21 : vector<8x2x1xf32>
    %cst_18 = arith.constant dense<0xFF800000> : vector<2x1xf32>
    %23 = vector.multi_reduction <maximumf>, %22, %cst_18 [0] : vector<8x2x1xf32> to vector<2x1xf32>
    %24 = vector.shape_cast %23 : vector<2x1xf32> to vector<1x2x1xf32>
    %25 = vector.broadcast %24 : vector<1x2x1xf32> to vector<8x2x1xf32>
    %26 = arith.subf %22, %25 : vector<8x2x1xf32>
    %27 = math.exp %26 : vector<8x2x1xf32>
    %cst_19 = arith.constant dense<0.000000e+00> : vector<2x1xf32>
    %28 = vector.multi_reduction <add>, %27, %cst_19 [0] : vector<8x2x1xf32> to vector<2x1xf32>
    %29 = vector.shape_cast %28 : vector<2x1xf32> to vector<1x2x1xf32>
    %30 = tpu.reciprocal %29 : vector<1x2x1xf32> -> vector<1x2x1xf32>
    %31 = vector.broadcast %30 : vector<1x2x1xf32> to vector<8x2x1xf32>
    %32 = arith.mulf %27, %31 : vector<8x2x1xf32>
    %c0_20 = arith.constant 0 : index
    %c0_21 = arith.constant 0 : index
    %c0_22 = arith.constant 0 : index
    %33 = vector.load %arg8[%c0_20, %c0_21, %c0_22] : memref<8x2x1xf32, #tpu.memory_space<vmem>>, vector<8x2x1xf32>
    tpu.vector_store %arg8[%c0_20, %c0_21, %c0_22], %32 {strides = array<i32>} : memref<8x2x1xf32, #tpu.memory_space<vmem>>, vector<8x2x1xf32>,
    %34 = vector.broadcast %32 : vector<8x2x1xf32> to vector<8x2x64xf32>
    %35 = arith.mulf %34, %14 : vector<8x2x64xf32>
    %cst_23 = arith.constant dense<0.000000e+00> : vector<2x64xf32>
    %36 = vector.multi_reduction <add>, %35, %cst_23 [0] : vector<8x2x64xf32> to vector<2x64xf32>
    %c0_24 = arith.constant 0 : index
    %c0_25 = arith.constant 0 : index
    %37 = vector.load %arg7[%c0_24, %c0_25] : memref<2x64xf32, #tpu.memory_space<vmem>>, vector<2x64xf32>
    tpu.vector_store %arg7[%c0_24, %c0_25], %36 {strides = array<i32>} : memref<2x64xf32, #tpu.memory_space<vmem>>, vector<2x64xf32>,
    return
  }
}

</mosaic_0001>

<bundles_post_ra>
// kernel: control_unit.1
= control target key start
LH: loop header
LB: loop body
LE: loop exit
PB: predicated region body
PF: predicated region fallthrough
CT: control target
= control target key end

     0   :  { %v583_v2 = vmov 0.0   ;;  %s872_s0 = inlined_call_operand.vmem [shape: f32[2,64], index: 0, kind: input, shape index: {}]   ;;  %s873_s1 = inlined_call_operand.vmem [shape: f32[2,64], index: 1, kind: input, shape index: {}]   ;;  %s874_s2 = inlined_call_operand.vmem [shape: f32[2,64], index: 2, kind: input, shape index: {}]   ;;  %s875_s3 = inlined_call_operand.vmem [shape: f32[8,2,64], index: 3, kind: input, shape index: {}]   ;;  %s876_s4 = inlined_call_operand.vmem [shape: f32[192,64], index: 4, kind: input, shape index: {}]   ;;  %s877_s5 = inlined_call_operand.vmem [shape: f32[1,64], index: 5, kind: input, shape index: {}]   ;;  %s878_s6 = inlined_call_operand.<no memory space> [shape: f32[1], index: 6, kind: input, shape index: {}]   ;;  %s879_s7 = inlined_call_operand.hbm [shape: f32[2,64], index: 7, kind: output, shape index: {0}]   ;;  %s880_s8 = inlined_call_operand.vmem [shape: f32[8,2,1], index: 8, kind: output, shape index: {1}]  }
   0x1   :  { %v47_v0 = vld [vmem:[%s876_s4 + $0x78] sm:$0xff]  ;;  %483 = vmatprep.subr.mxu0 %v583_v2  ;;  %502 = vmatprep.subr.mxu1 %v583_v2  ;;  %v46_v3 = vld [vmem:[%s876_s4 + $0x70] sm:$0xff]  ;;  %v45_v5 = vld [vmem:[%s876_s4 + $0x68] sm:$0xff] }
   0x2   :  { %v38_v1 = vld [vmem:[%s876_s4 + $0x38] sm:$0xff]  ;;  %v37_v4 = vld [vmem:[%s876_s4 + $0x30] sm:$0xff]  ;;  %484 = vmatpush3.msra.mxu0 %v47_v0  ;;  %v36_v6 = vld [vmem:[%s876_s4 + $0x28] sm:$0xff] }
   0x3   :  { %503 = vmatpush3.msra.mxu1 %v38_v1  ;;  %485 = vmatprep.subr.mxu0 %v583_v2  ;;  %v44_v7 = vld [vmem:[%s876_s4 + $0x60] sm:$0xff]  ;;  %v43_v9 = vld [vmem:[%s876_s4 + $0x58] sm:$0xff]  ;;  %v42_v11 = vld [vmem:[%s876_s4 + $0x50] sm:$0xff] }
   0x4   :  { %504 = vmatprep.subr.mxu1 %v583_v2  ;;  %486 = vmatpush3.msra.mxu0 %v46_v3  ;;  %v35_v8 = vld [vmem:[%s876_s4 + $0x20] sm:$0xff]  ;;  %v34_v10 = vld [vmem:[%s876_s4 + $0x18] sm:$0xff]  ;;  %v33_v12 = vld [vmem:[%s876_s4 + $0x10] sm:$0xff] }
   0x5   :  { %505 = vmatpush3.msra.mxu1 %v37_v4  ;;  %487 = vmatprep.subr.mxu0 %v583_v2 }
   0x6   :  { %506 = vmatprep.subr.mxu1 %v583_v2  ;;  %488 = vmatpush3.msra.mxu0 %v45_v5 }
   0x7   :  { %507 = vmatpush3.msra.mxu1 %v36_v6  ;;  %489 = vmatprep.subr.mxu0 %v583_v2 }
   0x8   :  { %508 = vmatprep.subr.mxu1 %v583_v2  ;;  %490 = vmatpush3.msra.mxu0 %v44_v7 }
   0x9   :  { %509 = vmatpush3.msra.mxu1 %v35_v8  ;;  %491 = vmatprep.subr.mxu0 %v583_v2 }
   0xa   :  { %510 = vmatprep.subr.mxu1 %v583_v2 }
   0xb   :  { %15 = vsyncpa [#allocation4], 0  ;;  %492 = vmatpush3.msra.mxu0 %v43_v9  ;;  %511 = vmatpush3.msra.mxu1 %v34_v10  ;;  %v41_v13 = vld [vmem:[%s876_s4 + $0x48] sm:$0xff]  ;;  %v40_v15 = vld [vmem:[%s876_s4 + $0x40] sm:$0xff]  ;;  %vm48_vm0 = vcmask 523264   ;;  %vm584_vm1 = vmmov 0  }
   0xc   :  { %493 = vmatprep.subr.mxu0 %v583_v2  ;;  %512 = vmatprep.subr.mxu1 %v583_v2  ;;  %v32_v14 = vld [vmem:[%s876_s4 + $0x8] sm:$0xff]  ;;  %v39_v16 = vld [vmem:[%s873_s1] sm:$0x3]  ;;  %v203_v19 = vld [vmem:[%s876_s4 + $0xb8] sm:$0xff]  ;;  %vm303_vm2 = vcmask 517120   ;;  %vm337_vm3 = vcmask 1041408  }
   0xd   :  { %494 = vmatpush3.msra.mxu0 %v42_v11  ;;  %513 = vmatpush3.msra.mxu1 %v33_v12  ;;  %v31_v17 = vld [vmem:[%s876_s4] sm:$0xff]  ;;  %v202_v20 = vld [vmem:[%s876_s4 + $0xb0] sm:$0xff]  ;;  %v201_v21 = vld [vmem:[%s876_s4 + $0xa8] sm:$0xff]  ;;  %vm401_vm4 = vcmask 1024  }
   0xe   :  { %495 = vmatprep.subr.mxu0 %v583_v2  ;;  %514 = vmatprep.subr.mxu1 %v583_v2  ;;  %v30_v18 = vld [vmem:[%s872_s0] sm:$0x3]  ;;  %v199_v23 = vld [vmem:[%s876_s4 + $0x98] sm:$0xff]  ;;  %v198_v24 = vld [vmem:[%s876_s4 + $0x90] sm:$0xff] }
   0xf   :  { %496 = vmatpush3.msra.mxu0 %v41_v13  ;;  %515 = vmatpush3.msra.mxu1 %v32_v14  ;;  %v200_v22 = vld [vmem:[%s876_s4 + $0xa0] sm:$0xff]  ;;  %v197_v25 = vld [vmem:[%s876_s4 + $0x88] sm:$0xff] }
  0x10   :  { %497 = vmatprep.subr.mxu0 %v583_v2  ;;  %499 = vmatprep.mubr.msk.f32.mxu0 %vm584_vm1, %v583_v2  ;;  %v196_v26 = vld [vmem:[%s876_s4 + $0x80] sm:$0xff]  ;;  %v774_v48 = vld [vmem:[%s875_s3 + $0xa] sm:$0x3]  ;;  %v779_v49 = vld [vmem:[%s875_s3 + $0x8] sm:$0x3] }
  0x11   :  { %498 = vmatpush3.msra.mxu0 %v40_v15  ;;  %516 = vmatprep.subr.mxu1 %v583_v2  ;;  %v195_v27 = vld [vmem:[%s874_s2] sm:$0x3]  ;;  %v748_v37 = vld [vmem:[%s875_s3 + $0x4] sm:$0x3]  ;;  %v758_v40 = vld [vmem:[%s875_s3 + $0x6] sm:$0x3] }
  0x12   :  { %500 = vmatmul.mubr.msk.f32.vlgmr.msra.gmra.mxu0 %vm48_vm0, %v39_v16  ;;  %517 = vmatpush3.msra.mxu1 %v31_v17  ;;  %v455_v34 = vld [vmem:[%s877_s5] ss:$0 sm:$0xff]  ;;  %v763_v41 = vld [vmem:[%s875_s3 + $0x2] sm:$0x3]  ;;  %v788_v54 = vld [vmem:[%s875_s3 + $0xe] sm:$0x3] }
  0x13   :  { %518 = vmatprep.mubr.msk.f32.mxu1 %vm584_vm1, %v583_v2  ;;  %521 = vmatprep.subr.mxu0 %v583_v2  ;;  %v753_v38 = vld [vmem:[%s875_s3] sm:$0x3]  ;;  %v793_v55 = vld [vmem:[%s875_s3 + $0xc] sm:$0x3] }
  0x14   :  { %519 = vmatmul.mubr.msk.f32.vlgmr.msra.gmra.mxu1 %vm48_vm0, %v30_v18  ;;  %522 = vmatpush3.msra.mxu0 %v203_v19 }
  0x15   :  { %523 = vmatprep.subr.mxu0 %v583_v2  ;;  %537 = vmatprep.mubr.msk.f32.mxu0 %vm584_vm1, %v583_v2 }
  0x16   :  { %524 = vmatpush3.msra.mxu0 %v202_v20 }
  0x17   :  { %525 = vmatprep.subr.mxu0 %v583_v2 }
  0x18   :  { %526 = vmatpush3.msra.mxu0 %v201_v21 }
  0x19   :  { %527 = vmatprep.subr.mxu0 %v583_v2 }
  0x1a   :  { %528 = vmatpush3.msra.mxu0 %v200_v22 }
  0x1b   :  { %529 = vmatprep.subr.mxu0 %v583_v2 }
  0x1c   :  { %530 = vmatpush3.msra.mxu0 %v199_v23 }
  0x1d   :  { %531 = vmatprep.subr.mxu0 %v583_v2 }
  0x1e   :  { %532 = vmatpush3.msra.mxu0 %v198_v24 }
  0x1f   :  { %533 = vmatprep.subr.mxu0 %v583_v2 }
  0x20   :  { %534 = vmatpush3.msra.mxu0 %v197_v25 }
  0x21   :  { %535 = vmatprep.subr.mxu0 %v583_v2  ;;  %v328_v2 = vstv %s878_s6 }
  0x22   :  { %536 = vmatpush3.msra.mxu0 %v196_v26 }
  0x23   :  { %538 = vmatmul.mubr.msk.f32.vlgmr.msra.gmra.mxu0 %vm48_vm0, %v195_v27 }
  0xd2   :  { %v118_v28 = vpop.f32.mrf.mxu0 }
  0xd4   :  { %v191_v29 = vpop.f32.mrf.mxu1  ;;  %v501_v30 = vpop.f32.mrf.mxu0 }
  0xd5   :  { %v192_v32 = vadd.f32 %v191_v29, %v118_v28 }
  0xd6   :  { %v520_v31 = vpop.f32.mrf.mxu1 }
  0xe3   :  { %v273_v33 = vpop.f32.mrf.mxu0 }
  0xe4   :  { %v277_v35 = vadd.f32 %v273_v33, %v192_v32 }
  0xe5   :  { %v539_v36 = vpop.f32.mrf.mxu0 }
  0xe6   :  { %v285_v39 = vadd.f32 %v455_v34, %v277_v35 }
  0xe8   :  { %v297_v42 = vmul.f32 %v748_v37, %v285_v39  ;;  %v295_v43 = vmul.f32 %v753_v38, %v285_v39  ;;  %v298_v46 = vmul.f32 %v758_v40, %v285_v39  ;;  %v296_v47 = vmul.f32 %v763_v41, %v285_v39 }
  0xe9   :  { %v300_v52 = vmul.f32 %v774_v48, %v285_v39  ;;  %v299_v53 = vmul.f32 %v779_v49, %v285_v39  ;;  %v302_v58 = vmul.f32 %v788_v54, %v285_v39  ;;  %v301_v59 = vmul.f32 %v793_v55, %v285_v39 }
  0xea   :  { %v310_v44 = vsel %vm303_vm2, %v297_v42, 0.0  ;;  %v304_v45 = vsel %vm303_vm2, %v295_v43, 0.0  ;;  %v313_v50 = vsel %vm303_vm2, %v298_v46, 0.0  ;;  %v307_v51 = vsel %vm303_vm2, %v296_v47, 0.0 }
  0xeb   :  { %311 = vadd.xlane.f32.xlu1 %v310_v44  ;;  %305 = vadd.xlane.f32.xlu0 %v304_v45  ;;  %v319_v56 = vsel %vm303_vm2, %v300_v52, 0.0  ;;  %v316_v57 = vsel %vm303_vm2, %v299_v53, 0.0  ;;  %v325_v60 = vsel %vm303_vm2, %v302_v58, 0.0  ;;  %v322_v61 = vsel %vm303_vm2, %v301_v59, 0.0 }
  0xef   :  { %314 = vadd.xlane.f32.xlu1 %v313_v50  ;;  %308 = vadd.xlane.f32.xlu0 %v307_v51 }
  0xf3   :  { %320 = vadd.xlane.f32.xlu1 %v319_v56  ;;  %317 = vadd.xlane.f32.xlu0 %v316_v57 }
  0xf7   :  { %326 = vadd.xlane.f32.xlu1 %v325_v60  ;;  %323 = vadd.xlane.f32.xlu0 %v322_v61 }
 0x174   :  { %v312_v62 = vpop.xlane.xlu1 %311  ;;  %v306_v63 = vpop.xlane.xlu0 %305 }
 0x175   :  { %v329_v5 = vadd.f32 %v328_v2, %v306_v63  ;;  %v331_v9 = vadd.f32 %v328_v2, %v312_v62 }
 0x177   :  { %v338_v15 = vsel %vm337_vm3, %v329_v5, -inf  ;;  %v340_v21 = vsel %vm337_vm3, %v331_v9, -inf }
 0x178   :  { %v315_v0 = vpop.xlane.xlu1 %314  ;;  %v309_v1 = vpop.xlane.xlu0 %308 }
 0x179   :  { %v330_v6 = vadd.f32 %v328_v2, %v309_v1  ;;  %v332_v10 = vadd.f32 %v328_v2, %v315_v0 }
 0x17b   :  { %v339_v16 = vsel %vm337_vm3, %v330_v6, -inf  ;;  %v341_v22 = vsel %vm337_vm3, %v332_v10, -inf }
 0x17c   :  { %v321_v3 = vpop.xlane.xlu1 %320  ;;  %v318_v4 = vpop.xlane.xlu0 %317 }
 0x17d   :  { %v334_v7 = vadd.f32 %v328_v2, %v321_v3  ;;  %v333_v8 = vadd.f32 %v328_v2, %v318_v4 }
 0x17f   :  { %v344_v11 = vsel %vm337_vm3, %v334_v7, -inf  ;;  %v342_v12 = vsel %vm337_vm3, %v333_v8, -inf }
 0x180   :  { %v327_v13 = vpop.xlane.xlu1 %326  ;;  %v324_v14 = vpop.xlane.xlu0 %323  ;;  %v345_v19 = vmax.f32 %v339_v16, %v344_v11  ;;  %v343_v20 = vmax.f32 %v338_v15, %v342_v12 }
 0x181   :  { %v336_v17 = vadd.f32 %v328_v2, %v327_v13  ;;  %v335_v18 = vadd.f32 %v328_v2, %v324_v14 }
 0x182   :  { %v350_v27 = vmax.f32 %v343_v20, %v345_v19 }
 0x183   :  { %v348_v23 = vsel %vm337_vm3, %v336_v17, -inf  ;;  %v346_v24 = vsel %vm337_vm3, %v335_v18, -inf }
 0x184   :  { %v349_v25 = vmax.f32 %v341_v22, %v348_v23  ;;  %v347_v26 = vmax.f32 %v340_v21, %v346_v24 }
 0x186   :  { %v351_v28 = vmax.f32 %v347_v26, %v349_v25 }
 0x188   :  { %v352_v29 = vmax.f32 %v350_v27, %v351_v28 }
 0x18a   :  { %v353_v30 = vsub.f32 %v329_v5, %v352_v29  ;;  %v354_v31 = vsub.f32 %v330_v6, %v352_v29  ;;  %v355_v32 = vsub.f32 %v331_v9, %v352_v29  ;;  %v356_v33 = vsub.f32 %v332_v10, %v352_v29 }
 0x18b   :  { %v357_v34 = vsub.f32 %v333_v8, %v352_v29  ;;  %v358_v42 = vsub.f32 %v334_v7, %v352_v29  ;;  %v359_v44 = vsub.f32 %v335_v18, %v352_v29  ;;  %v360_v46 = vsub.f32 %v336_v17, %v352_v29 }
 0x18c   :  { %v361_v35 = vmul.f32 1.442695, %v353_v30  ;;  %v363_v36 = vmul.f32 1.442695, %v354_v31  ;;  %v365_v39 = vmul.f32 1.442695, %v355_v32 }
 0x18d   :  { %v367_v43 = vmul.f32 1.442695, %v356_v33  ;;  %v369_v45 = vmul.f32 1.442695, %v357_v34  ;;  %v371_v47 = vmul.f32 1.442695, %v358_v42 }
 0x18e   :  { %543 = vpow2.f32 %v361_v35  ;;  %v373_v50 = vmul.f32 1.442695, %v359_v44  ;;  %v375_v51 = vmul.f32 1.442695, %v360_v46 }
 0x18f   :  { %545 = vpow2.f32 %v363_v36 }
 0x190   :  { %547 = vpow2.f32 %v365_v39 }
 0x191   :  { %549 = vpow2.f32 %v367_v43 }
 0x192   :  { %551 = vpow2.f32 %v369_v45 }
 0x193   :  { %553 = vpow2.f32 %v371_v47 }
 0x194   :  { %555 = vpow2.f32 %v373_v50 }
 0x195   :  { %557 = vpow2.f32 %v375_v51 }
 0x19b   :  { %v544_v52 = vpop.eup %543 }
 0x19c   :  { %v546_v53 = vpop.eup %545  ;;  %v377_v56 = vsel %vm337_vm3, %v544_v52, 0.0 }
 0x19d   :  { %v548_v57 = vpop.eup %547  ;;  %v378_v58 = vsel %vm337_vm3, %v546_v53, 0.0 }
 0x19e   :  { %v550_v59 = vpop.eup %549  ;;  %v379_v60 = vadd.f32 %v378_v58, %v377_v56  ;;  %v380_v61 = vsel %vm337_vm3, %v548_v57, 0.0 }
 0x19f   :  { %v552_v62 = vpop.eup %551  ;;  %v382_v0 = vsel %vm337_vm3, %v550_v59, 0.0 }
 0x1a0   :  { %v381_v63 = vadd.f32 %v380_v61, %v379_v60  ;;  %v554_v1 = vpop.eup %553  ;;  %v384_v3 = vsel %vm337_vm3, %v552_v62, 0.0 }
 0x1a1   :  { %v556_v4 = vpop.eup %555  ;;  %v386_v6 = vsel %vm337_vm3, %v554_v1, 0.0 }
 0x1a2   :  { %v383_v2 = vadd.f32 %v382_v0, %v381_v63  ;;  %v558_v7 = vpop.eup %557  ;;  %v388_v9 = vsel %vm337_vm3, %v556_v4, 0.0 }
 0x1a3   :  { %v390_v11 = vsel %vm337_vm3, %v558_v7, 0.0 }
 0x1a4   :  { %v385_v5 = vadd.f32 %v384_v3, %v383_v2 }
 0x1a6   :  { %v387_v8 = vadd.f32 %v386_v6, %v385_v5 }
 0x1a8   :  { %v389_v10 = vadd.f32 %v388_v9, %v387_v8 }
 0x1aa   :  { %v391_v12 = vadd.f32 %v390_v11, %v389_v10 }
 0x1ac   :  { %559 = vrcp.f32 %v391_v12 }
 0x1b9   :  { %v560_v13 = vpop.eup %559 }
 0x1ba   :  { %v393_v14 = vmul.f32 %v560_v13, %v544_v52  ;;  %v394_v15 = vmul.f32 %v560_v13, %v546_v53  ;;  %v395_v16 = vmul.f32 %v560_v13, %v548_v57  ;;  %v396_v17 = vmul.f32 %v560_v13, %v550_v59 }
 0x1bb   :  { %v397_v18 = vmul.f32 %v560_v13, %v552_v62  ;;  %v398_v19 = vmul.f32 %v560_v13, %v554_v1  ;;  %v399_v20 = vmul.f32 %v560_v13, %v556_v4  ;;  %v400_v21 = vmul.f32 %v560_v13, %v558_v7 }
 0x1bc   :  { %402 = vst.msk [vmem:[%s880_s8] sm:$0x3] %vm401_vm4, %v393_v14  ;;  %403 = vst.msk [vmem:[%s880_s8 + $0x2] sm:$0x3] %vm401_vm4, %v394_v15  ;;  %v410_v22 = vmul.f32 %v393_v14, %v753_v38  ;;  %v411_v23 = vmul.f32 %v394_v15, %v763_v41  ;;  %v412_v24 = vmul.f32 %v395_v16, %v748_v37 }
 0x1bd   :  { %404 = vst.msk [vmem:[%s880_s8 + $0x4] sm:$0x3] %vm401_vm4, %v395_v16  ;;  %405 = vst.msk [vmem:[%s880_s8 + $0x6] sm:$0x3] %vm401_vm4, %v396_v17  ;;  %v413_v37 = vmul.f32 %v396_v17, %v758_v40  ;;  %v414_v26 = vmul.f32 %v397_v18, %v779_v49  ;;  %v415_v29 = vmul.f32 %v398_v19, %v774_v48 }
 0x1be   :  { %406 = vst.msk [vmem:[%s880_s8 + $0x8] sm:$0x3] %vm401_vm4, %v397_v18  ;;  %407 = vst.msk [vmem:[%s880_s8 + $0xa] sm:$0x3] %vm401_vm4, %v398_v19  ;;  %v418_v38 = vsel %vm303_vm2, %v410_v22, 0.0  ;;  %v419_v41 = vsel %vm303_vm2, %v411_v23, 0.0  ;;  %v416_v32 = vmul.f32 %v399_v20, %v793_v55  ;;  %v417_v34 = vmul.f32 %v400_v21, %v788_v54 }
 0x1bf   :  { %408 = vst.msk [vmem:[%s880_s8 + $0xc] sm:$0x3] %vm401_vm4, %v399_v20  ;;  %409 = vst.msk [vmem:[%s880_s8 + $0xe] sm:$0x3] %vm401_vm4, %v400_v21  ;;  %v420_v25 = vadd.f32 %v419_v41, %v418_v38  ;;  %v421_v27 = vsel %vm303_vm2, %v412_v24, 0.0  ;;  %v423_v30 = vsel %vm303_vm2, %v413_v37, 0.0 }
 0x1c0   :  { %v425_v33 = vsel %vm303_vm2, %v414_v26, 0.0  ;;  %v427_v35 = vsel %vm303_vm2, %v415_v29, 0.0  ;;  %v429_v49 = vsel %vm303_vm2, %v416_v32, 0.0  ;;  %s585_s8 = smov [#allocation3]   ;;  %v431_v48 = vsel %vm303_vm2, %v417_v34, 0.0 }
 0x1c1   :  { %v422_v28 = vadd.f32 %v421_v27, %v420_v25  ;;  %s440_s18 = sshll.u32 %s585_s8, 4  ;;  %s441_s18 = int_to_ptr.vmem [resolvable:$true] %s440_s18 }
 0x1c2   :  { %s561_s5 = scalar_lea.vmem %s441_s18, 32  ;;  %p566_p1 = scmp.lt.s32.totalorder %s441_s18, %s441_s18 }
 0x1c3   :  { %v424_v31 = vadd.f32 %v423_v30, %v422_v28  ;;  %p562_p0 = scmp.ne.s32.totalorder %s441_s18, %s561_s5  ;;  %p567_p2 = scmp.lt.s32.totalorder %s561_s5, %s561_s5 }
 0x1c5   :  { %v426_v40 = vadd.f32 %v425_v33, %v424_v31  ;;  %p568_p3 = por %p567_p2, %p566_p1 }
 0x1c7   :  { %v428_v36 = vadd.f32 %v427_v35, %v426_v40  ;;  %p569_p4 = pnand %p568_p3, %p562_p0 }
 0x1c9   :  { %v430_v39 = vadd.f32 %v429_v49, %v428_v36 }
 0x1cb   :  { %v432_v42 = vadd.f32 %v431_v48, %v430_v39 }
 0x1cd   :  { %433 = vst.msk [vmem:[#allocation3] sm:$0x3] %vm303_vm2, %v432_v42 }
 0x1ce   :  { %572 = shalt.err (!%p569_p4)
}
 0x1cf   :  { %443 = dma.vmem_to_hbm [thread:$0]  %s441_s18, 32, %s879_s7, [#allocation4]  }
 0x1d0   :  { %581 = dma.done.wait [#allocation4], 32  }
 0x1d1   :  { %582 = vsyncadd [#allocation4], 4294967264 }
 0x1d2   :  { %451 = vsyncpa [#allocation4], 1 }

</bundles_post_ra>
